<compile_context>
chip_gen: v7x
topology: tpu7x:2x2x1
jax: 0.10.0
libtpu: 0.0.40
codegen_flags: <defaults>
</compile_context>

<pallas_src>
import functools

import jax
import jax.numpy as jnp
from jax import lax
from jax.experimental import pallas as pl
from jax.experimental.pallas import tpu as pltpu

EPS = 1e-5


def _cdiv(a, b):
  return -(-a // b)


def _round_up(x, m):
  return _cdiv(x, m) * m


def _pad_axis(a, axis, size):
  if a.shape[axis] == size:
    return a
  pad = [(0, 0)] * a.ndim
  pad[axis] = (0, size - a.shape[axis])
  return jnp.pad(a, pad)


def _gelu_tanh(x):
  # tanh-approximate GELU: one EUP tanh + a short VALU chain; differs from the
  # exact erf GELU by < ~3e-3 abs, below the bf16 matmul noise floor.
  c = 0.7978845608028654  # sqrt(2/pi)
  return 0.5 * x * (1.0 + jnp.tanh(c * (x + 0.044715 * x * x * x)))


def _tpu_knobs():
  """Per-generation knobs: bf16 depthwise MAC, VMEM limit, streamed-block cap."""
  kind = ""
  try:
    kind = jax.devices()[0].device_kind.lower()
  except Exception:
    pass
  old_vpu = any(g in kind for g in ("v2", "v3", "v4", "v5"))   # no bf16 VALU
  big_vmem = any(g in kind for g in ("v5", "v6"))              # 128 MiB physical
  vmem_limit = (64 if big_vmem else 32) * 1024 * 1024
  block_cap = (8 if big_vmem else 4) * 1024 * 1024
  return (not old_vpu), vmem_limit, block_cap


def _bn_fold(gamma, beta, mean, var):
  s = gamma / jnp.sqrt(var + EPS)
  return s, beta - mean * s


def _repvit_kernel(x_ref, xh_ref, dw_ref, wpw_ref, bpw_ref,
                   w1_ref, bh_ref, w2_ref, bo_ref, out_ref, *, TRo, Wep):
  """Fused stride-2 RepViTBlock forward for one (image, row-tile) grid step.

  x_ref : (1, TRo, 4, Wep, Cp) bf16   row-pairs x {(ev-row,ev-col),(ev,od),(od,ev),(od,od)}
  xh_ref: (1, 1, 2, Wep, Cp)  bf16   halo = even row of the next row-pair (both col parities)
  """
  mac_dt = dw_ref.dtype
  Cp = x_ref.shape[-1]
  Co = out_ref.shape[-1]

  def slab(kh, cpar):
    # Output row r taps padded rows 2r (kh=0), 2r+1 (kh=1), 2r+2 (kh=2).
    if kh == 0:                         # even row of pair r
      return x_ref[0, :, 0 + cpar, :, :].astype(mac_dt)          # (TRo, Wep, Cp)
    if kh == 1:                         # odd row of pair r
      return x_ref[0, :, 2 + cpar, :, :].astype(mac_dt)
    # kh == 2: even row of pair r+1; the last one comes from the halo block.
    halo = xh_ref[0, :, cpar, :, :].astype(mac_dt)               # (1, Wep, Cp)
    if TRo == 1:
      return halo
    rest = x_ref[0, pl.ds(1, TRo - 1), 0 + cpar, :, :].astype(mac_dt)
    return jnp.concatenate([rest, halo], axis=0)

  # ---- token mixer: depthwise 3x3 stride-2 conv (BN1 scale folded into dw) --
  base = None      # kw in {0,1}: column-aligned taps
  shifted = None   # kw == 2: even slab shifted left by one column
  for kh in range(3):
    ev = slab(kh, 0)
    od = slab(kh, 1)
    term = ev * dw_ref[3 * kh + 0] + od * dw_ref[3 * kh + 1]
    base = term if base is None else base + term
    t2 = ev * dw_ref[3 * kh + 2]
    shifted = t2 if shifted is None else shifted + t2

  # Single one-column shift for the whole kw==2 group; the dead last column
  # absorbs the zero fill (valid output columns are < Wep-1 by construction).
  sh = jnp.concatenate(
      [shifted[:, 1:, :], jnp.zeros_like(shifted[:, :1, :])], axis=1)
  acc = base + sh                                                # (TRo, Wep, Cp)

  # ---- token mixer 1x1 conv (+ folded BN1/BN2 bias) -------------------------
  u = acc.reshape(TRo * Wep, Cp).astype(jnp.bfloat16)            # free: Wep%16==0
  t = jnp.dot(u, wpw_ref[...], preferred_element_type=jnp.float32) + bpw_ref[...]

  # ---- channel mixer (Residual FFN): 1x1 -> GELU -> 1x1, + residual ---------
  h = jnp.dot(t.astype(jnp.bfloat16), w1_ref[...],
              preferred_element_type=jnp.float32) + bh_ref[...]
  g = _gelu_tanh(h)
  y = jnp.dot(g.astype(jnp.bfloat16), w2_ref[...],
              preferred_element_type=jnp.float32) + bo_ref[...]

  out_ref[...] = (t + y).astype(out_ref.dtype).reshape(1, TRo, Wep, Co)


def init_params(key, inp, oup):
  """Deterministic synthetic parameters, PyTorch weight layouts."""
  ks = jax.random.split(key, 16)

  def bn(k, c):
    k1, k2, k3, k4 = jax.random.split(k, 4)
    gamma = jax.random.uniform(k1, (c,), jnp.float32, 0.5, 1.5)
    beta = 0.1 * jax.random.normal(k2, (c,), jnp.float32)
    mean = 0.1 * jax.random.normal(k3, (c,), jnp.float32)
    var = jax.random.uniform(k4, (c,), jnp.float32, 0.5, 1.5)
    return gamma, beta, mean, var

  hidden = 2 * oup
  return {
      "dw_w": 0.3 * jax.random.normal(ks[0], (inp, 1, 3, 3), jnp.float32),   # depthwise OIHW
      "bn1": bn(ks[1], inp),
      "pw_w": 0.3 * jax.random.normal(ks[2], (oup, inp, 1, 1), jnp.float32), # 1x1 OIHW
      "bn2": bn(ks[3], oup),
      "w1": 0.3 * jax.random.normal(ks[4], (hidden, oup, 1, 1), jnp.float32),
      "bn3": bn(ks[5], hidden),
      "w2": 0.3 * jax.random.normal(ks[6], (oup, hidden, 1, 1), jnp.float32),
      "bn4": bn(ks[7], oup),
  }


@functools.partial(jax.jit, static_argnames=("inp", "oup"))
def repvit_block_pallas(x_nchw, params, *, inp, oup):
  N, C, H, W = x_nchw.shape
  assert C == inp
  hidden = 2 * oup
  Ho = (H - 1) // 2 + 1
  Wo = (W - 1) // 2 + 1

  bf16_mac, vmem_limit, block_cap = _tpu_knobs()
  mac_dtype = jnp.bfloat16 if bf16_mac else jnp.float32

  # lane-dense channel padding (multiples of 128); see narrow-channel TODO above.
  Cp = _round_up(inp, 128)
  Cop = _round_up(oup, 128)
  Chp = _round_up(hidden, 128)

  # sublane-dense even/odd slab width (multiple of the bf16 packing granule).
  Wep = _round_up(Wo + 1, 16)

  # ---- row tile selection ----------------------------------------------------
  TRo = max(1, min(Ho, max(1, 512 // Wep)))             # ~512 matmul rows / step
  while N * _cdiv(Ho, TRo) < 4 and TRo > 1:             # keep >= 4 parallel steps
    TRo = _cdiv(TRo, 2)
  while TRo > 1 and 2 * (TRo * 4 * Wep * Cp * 2) > block_cap:   # double-buffered
    TRo = _cdiv(TRo, 2)
  n_tiles = _cdiv(Ho, TRo)
  Hp2 = TRo * n_tiles + 1                               # row pairs incl. halo pair

  # ---- fold BatchNorms (inference mode) into weights / biases ----------------
  s1, b1 = _bn_fold(*params["bn1"])
  s2, b2 = _bn_fold(*params["bn2"])
  s3, b3 = _bn_fold(*params["bn3"])
  s4, b4 = _bn_fold(*params["bn4"])

  dw = jnp.transpose(params["dw_w"].reshape(inp, 9), (1, 0)) * s1[None, :]   # (9, inp)
  wpw = jnp.transpose(params["pw_w"][:, :, 0, 0], (1, 0)) * s2[None, :]      # (inp, oup)
  bpw = b1 @ wpw + b2                                                        # (oup,)
  w1 = jnp.transpose(params["w1"][:, :, 0, 0], (1, 0)) * s3[None, :]         # (oup, hidden)
  w2 = jnp.transpose(params["w2"][:, :, 0, 0], (1, 0)) * s4[None, :]         # (hidden, oup)

  dw_p = _pad_axis(dw, 1, Cp).reshape(9, 1, Cp).astype(mac_dtype)
  wpw_p = _pad_axis(_pad_axis(wpw, 0, Cp), 1, Cop).astype(jnp.bfloat16)
  bpw_p = _pad_axis(bpw.reshape(1, -1), 1, Cop).astype(jnp.float32)
  w1_p = _pad_axis(_pad_axis(w1, 0, Cop), 1, Chp).astype(jnp.bfloat16)
  bh_p = _pad_axis(b3.reshape(1, -1), 1, Chp).astype(jnp.float32)
  w2_p = _pad_axis(_pad_axis(w2, 0, Chp), 1, Cop).astype(jnp.bfloat16)
  bo_p = _pad_axis(b4.reshape(1, -1), 1, Cop).astype(jnp.float32)

  # ---- input: one fused transpose + pad + even/odd split pass ----------------
  Hrows = 2 * Hp2
  Wcols = 2 * Wep
  x = jnp.transpose(x_nchw, (0, 2, 3, 1)).astype(jnp.bfloat16)               # NHWC bf16
  x = jnp.pad(x, ((0, 0), (1, Hrows - H - 1), (1, Wcols - W - 1), (0, Cp - inp)))
  x_eo = x.reshape(N, Hp2, 2, Wep, 2, Cp).transpose(0, 1, 2, 4, 3, 5)
  x_eo = x_eo.reshape(N, Hp2, 4, Wep, Cp)   # merged dim: 2*row_parity + col_parity

  # ---- pallas_call ------------------------------------------------------------
  kern = functools.partial(_repvit_kernel, TRo=TRo, Wep=Wep)
  wfull = lambda shape: pl.BlockSpec(shape, lambda n, i, _s=shape: (0,) * len(_s))

  M_tot = N * n_tiles * TRo * Wep
  ce = pl.CostEstimate(
      flops=2 * M_tot * (9 * Cp + Cp * Cop + Cop * Chp + Chp * Cop),
      transcendentals=M_tot * Chp,
      bytes_accessed=(x_eo.size * 2 + M_tot * Cop * 2
                      + (Cp * Cop + Cop * Chp + Chp * Cop) * 2))

  out = pl.pallas_call(
      kern,
      out_shape=jax.ShapeDtypeStruct((N, TRo * n_tiles, Wep, Cop), jnp.bfloat16),
      grid=(N, n_tiles),
      in_specs=[
          # main row-pair window for this tile
          pl.BlockSpec((1, TRo, 4, Wep, Cp), lambda n, i: (n, i, 0, 0, 0)),
          # halo: even row of the next row-pair (same array, overlapping window)
          pl.BlockSpec((1, 1, 2, Wep, Cp),
                       lambda n, i: (n, TRo * (i + 1), 0, 0, 0)),
          wfull((9, 1, Cp)),                       # dw weights (BN1 folded)
          wfull((Cp, Cop)), wfull((1, Cop)),       # pw weight / folded bias
          wfull((Cop, Chp)), wfull((1, Chp)),      # fc1 / bias
          wfull((Chp, Cop)), wfull((1, Cop)),      # fc2 / bias
      ],
      out_specs=pl.BlockSpec((1, TRo, Wep, Cop), lambda n, i: (n, i, 0, 0)),
      compiler_params=pltpu.CompilerParams(
          dimension_semantics=("parallel", "parallel"),
          vmem_limit_bytes=vmem_limit),
      cost_estimate=ce,
  )(x_eo, x_eo, dw_p, wpw_p, bpw_p, w1_p, bh_p, w2_p, bo_p)

  # one fused slice + transpose + cast pass back to NCHW f32
  out = out[:, :Ho, :Wo, :oup]
  return jnp.transpose(out, (0, 3, 1, 2)).astype(jnp.float32)


def repvit_block_reference(x_nchw, params, *, inp, oup):
  """Independent pure-JAX f32 reference (lax.conv + exact GELU)."""
  def bn(x, g, b, m, v):
    s = g / jnp.sqrt(v + EPS)
    return x * s[None, :, None, None] + (b - m * s)[None, :, None, None]

  dn = ("NCHW", "OIHW", "NCHW")
  x = x_nchw.astype(jnp.float32)
  y = lax.conv_general_dilated(x, params["dw_w"], (2, 2), ((1, 1), (1, 1)),
                               feature_group_count=inp, dimension_numbers=dn)
  y = bn(y, *params["bn1"])
  y = lax.conv_general_dilated(y, params["pw_w"], (1, 1), "VALID", dimension_numbers=dn)
  t = bn(y, *params["bn2"])
  h = lax.conv_general_dilated(t, params["w1"], (1, 1), "VALID", dimension_numbers=dn)
  h = bn(h, *params["bn3"])
  h = jax.nn.gelu(h, approximate=False)
  z = lax.conv_general_dilated(h, params["w2"], (1, 1), "VALID", dimension_numbers=dn)
  z = bn(z, *params["bn4"])
  return t + z


if __name__ == "__main__":
  inp, oup = 4, 8
  N, H, W = 2, 16, 16

  key = jax.random.PRNGKey(0)
  kx, kp = jax.random.split(key)
  x = jax.random.normal(kx, (N, inp, H, W), jnp.float32)
  params = init_params(kp, inp, oup)

  out = jax.block_until_ready(repvit_block_pallas(x, params, inp=inp, oup=oup))
  ref = jax.block_until_ready(repvit_block_reference(x, params, inp=inp, oup=oup))

  assert out.shape == (N, oup, H // 2, W // 2), out.shape
  # bf16 operands / bf16 output + tanh-approx GELU => relaxed tolerance vs f32 ref.
  err = float(jnp.max(jnp.abs(out - ref)))
  assert jnp.allclose(out, ref, atol=5e-2, rtol=5e-2), err
  print("KERNEL_OK")
</pallas_src>

<mosaic_0001>
module attributes {stable_mosaic.version = 11 : i64} {
  func.func @_repvit_kernel(%arg0: i32, %arg1: i32, %arg2: memref<1x4x4x16x128xbf16, #tpu.memory_space<vmem>>, %arg3: memref<1x1x2x16x128xbf16, #tpu.memory_space<vmem>>, %arg4: memref<9x1x128xbf16, #tpu.memory_space<vmem>>, %arg5: memref<128x128xbf16, #tpu.memory_space<vmem>>, %arg6: memref<1x128xf32, #tpu.memory_space<vmem>>, %arg7: memref<128x128xbf16, #tpu.memory_space<vmem>>, %arg8: memref<1x128xf32, #tpu.memory_space<vmem>>, %arg9: memref<128x128xbf16, #tpu.memory_space<vmem>>, %arg10: memref<1x128xf32, #tpu.memory_space<vmem>>, %arg11: memref<1x4x16x128xbf16, #tpu.memory_space<vmem>>) attributes {dimension_semantics = [#tpu.dimension_semantics<parallel>, #tpu.dimension_semantics<parallel>], iteration_bounds = array<i64: 2, 2>, scalar_prefetch = 0 : i64, scratch_operands = 0 : i64, tpu.core_type = #tpu.core_type<tc>, window_params = [{transform_indices = @transform_0, window_bounds = array<i64: 1, 4, 4, 16, 128>}, {transform_indices = @transform_1, window_bounds = array<i64: 1, 1, 2, 16, 128>}, {pipeline_mode = #tpu.pipeline_mode<synchronous>, transform_indices = @transform_2, window_bounds = array<i64: 9, 1, 128>}, {pipeline_mode = #tpu.pipeline_mode<synchronous>, transform_indices = @transform_3, window_bounds = array<i64: 128, 128>}, {pipeline_mode = #tpu.pipeline_mode<synchronous>, transform_indices = @transform_4, window_bounds = array<i64: 1, 128>}, {pipeline_mode = #tpu.pipeline_mode<synchronous>, transform_indices = @transform_5, window_bounds = array<i64: 128, 128>}, {pipeline_mode = #tpu.pipeline_mode<synchronous>, transform_indices = @transform_6, window_bounds = array<i64: 1, 128>}, {pipeline_mode = #tpu.pipeline_mode<synchronous>, transform_indices = @transform_7, window_bounds = array<i64: 128, 128>}, {pipeline_mode = #tpu.pipeline_mode<synchronous>, transform_indices = @transform_8, window_bounds = array<i64: 1, 128>}, {transform_indices = @transform_9, window_bounds = array<i64: 1, 4, 16, 128>}]} {
    %c0 = arith.constant 0 : index
    %c0_0 = arith.constant 0 : index
    %c0_1 = arith.constant 0 : index
    %c0_2 = arith.constant 0 : index
    %c0_3 = arith.constant 0 : index
    %0 = vector.load %arg2[%c0, %c0_0, %c0_1, %c0_2, %c0_3] : memref<1x4x4x16x128xbf16, #tpu.memory_space<vmem>>, vector<1x4x1x16x128xbf16>
    %1 = vector.shape_cast %0 : vector<1x4x1x16x128xbf16> to vector<4x16x128xbf16>
    %c0_4 = arith.constant 0 : index
    %c0_5 = arith.constant 0 : index
    %c1 = arith.constant 1 : index
    %c0_6 = arith.constant 0 : index
    %c0_7 = arith.constant 0 : index
    %2 = vector.load %arg2[%c0_4, %c0_5, %c1, %c0_6, %c0_7] : memref<1x4x4x16x128xbf16, #tpu.memory_space<vmem>>, vector<1x4x1x16x128xbf16>
    %3 = vector.shape_cast %2 : vector<1x4x1x16x128xbf16> to vector<4x16x128xbf16>
    %c0_8 = arith.constant 0 : index
    %c0_9 = arith.constant 0 : index
    %c0_10 = arith.constant 0 : index
    %4 = vector.load %arg4[%c0_8, %c0_9, %c0_10] : memref<9x1x128xbf16, #tpu.memory_space<vmem>>, vector<1x1x128xbf16>
    %5 = vector.shape_cast %4 : vector<1x1x128xbf16> to vector<1x128xbf16>
    %6 = vector.shape_cast %5 : vector<1x128xbf16> to vector<1x1x128xbf16>
    %7 = vector.broadcast %6 : vector<1x1x128xbf16> to vector<4x16x128xbf16>
    %8 = arith.mulf %1, %7 : vector<4x16x128xbf16>
    %c1_11 = arith.constant 1 : index
    %c0_12 = arith.constant 0 : index
    %c0_13 = arith.constant 0 : index
    %9 = vector.load %arg4[%c1_11, %c0_12, %c0_13] : memref<9x1x128xbf16, #tpu.memory_space<vmem>>, vector<1x1x128xbf16>
    %10 = vector.shape_cast %9 : vector<1x1x128xbf16> to vector<1x128xbf16>
    %11 = vector.shape_cast %10 : vector<1x128xbf16> to vector<1x1x128xbf16>
    %12 = vector.broadcast %11 : vector<1x1x128xbf16> to vector<4x16x128xbf16>
    %13 = arith.mulf %3, %12 : vector<4x16x128xbf16>
    %14 = arith.addf %8, %13 : vector<4x16x128xbf16>
    %c2 = arith.constant 2 : index
    %c0_14 = arith.constant 0 : index
    %c0_15 = arith.constant 0 : index
    %15 = vector.load %arg4[%c2, %c0_14, %c0_15] : memref<9x1x128xbf16, #tpu.memory_space<vmem>>, vector<1x1x128xbf16>
    %16 = vector.shape_cast %15 : vector<1x1x128xbf16> to vector<1x128xbf16>
    %17 = vector.shape_cast %16 : vector<1x128xbf16> to vector<1x1x128xbf16>
    %18 = vector.broadcast %17 : vector<1x1x128xbf16> to vector<4x16x128xbf16>
    %19 = arith.mulf %1, %18 : vector<4x16x128xbf16>
    %c0_16 = arith.constant 0 : index
    %c0_17 = arith.constant 0 : index
    %c2_18 = arith.constant 2 : index
    %c0_19 = arith.constant 0 : index
    %c0_20 = arith.constant 0 : index
    %20 = vector.load %arg2[%c0_16, %c0_17, %c2_18, %c0_19, %c0_20] : memref<1x4x4x16x128xbf16, #tpu.memory_space<vmem>>, vector<1x4x1x16x128xbf16>
    %21 = vector.shape_cast %20 : vector<1x4x1x16x128xbf16> to vector<4x16x128xbf16>
    %c0_21 = arith.constant 0 : index
    %c0_22 = arith.constant 0 : index
    %c3 = arith.constant 3 : index
    %c0_23 = arith.constant 0 : index
    %c0_24 = arith.constant 0 : index
    %22 = vector.load %arg2[%c0_21, %c0_22, %c3, %c0_23, %c0_24] : memref<1x4x4x16x128xbf16, #tpu.memory_space<vmem>>, vector<1x4x1x16x128xbf16>
    %23 = vector.shape_cast %22 : vector<1x4x1x16x128xbf16> to vector<4x16x128xbf16>
    %c3_25 = arith.constant 3 : index
    %c0_26 = arith.constant 0 : index
    %c0_27 = arith.constant 0 : index
    %24 = vector.load %arg4[%c3_25, %c0_26, %c0_27] : memref<9x1x128xbf16, #tpu.memory_space<vmem>>, vector<1x1x128xbf16>
    %25 = vector.shape_cast %24 : vector<1x1x128xbf16> to vector<1x128xbf16>
    %26 = vector.shape_cast %25 : vector<1x128xbf16> to vector<1x1x128xbf16>
    %27 = vector.broadcast %26 : vector<1x1x128xbf16> to vector<4x16x128xbf16>
    %28 = arith.mulf %21, %27 : vector<4x16x128xbf16>
    %c4 = arith.constant 4 : index
    %c0_28 = arith.constant 0 : index
    %c0_29 = arith.constant 0 : index
    %29 = vector.load %arg4[%c4, %c0_28, %c0_29] : memref<9x1x128xbf16, #tpu.memory_space<vmem>>, vector<1x1x128xbf16>
    %30 = vector.shape_cast %29 : vector<1x1x128xbf16> to vector<1x128xbf16>
    %31 = vector.shape_cast %30 : vector<1x128xbf16> to vector<1x1x128xbf16>
    %32 = vector.broadcast %31 : vector<1x1x128xbf16> to vector<4x16x128xbf16>
    %33 = arith.mulf %23, %32 : vector<4x16x128xbf16>
    %34 = arith.addf %28, %33 : vector<4x16x128xbf16>
    %35 = arith.addf %14, %34 : vector<4x16x128xbf16>
    %c5 = arith.constant 5 : index
    %c0_30 = arith.constant 0 : index
    %c0_31 = arith.constant 0 : index
    %36 = vector.load %arg4[%c5, %c0_30, %c0_31] : memref<9x1x128xbf16, #tpu.memory_space<vmem>>, vector<1x1x128xbf16>
    %37 = vector.shape_cast %36 : vector<1x1x128xbf16> to vector<1x128xbf16>
    %38 = vector.shape_cast %37 : vector<1x128xbf16> to vector<1x1x128xbf16>
    %39 = vector.broadcast %38 : vector<1x1x128xbf16> to vector<4x16x128xbf16>
    %40 = arith.mulf %21, %39 : vector<4x16x128xbf16>
    %41 = arith.addf %19, %40 : vector<4x16x128xbf16>
    %c0_32 = arith.constant 0 : index
    %c0_33 = arith.constant 0 : index
    %c0_34 = arith.constant 0 : index
    %c0_35 = arith.constant 0 : index
    %c0_36 = arith.constant 0 : index
    %42 = vector.load %arg3[%c0_32, %c0_33, %c0_34, %c0_35, %c0_36] : memref<1x1x2x16x128xbf16, #tpu.memory_space<vmem>>, vector<1x1x1x16x128xbf16>
    %43 = vector.shape_cast %42 : vector<1x1x1x16x128xbf16> to vector<1x16x128xbf16>
    %c0_37 = arith.constant 0 : index
    %c1_38 = arith.constant 1 : index
    %c0_39 = arith.constant 0 : index
    %c0_40 = arith.constant 0 : index
    %c0_41 = arith.constant 0 : index
    %44 = vector.load %arg2[%c0_37, %c1_38, %c0_39, %c0_40, %c0_41] : memref<1x4x4x16x128xbf16, #tpu.memory_space<vmem>>, vector<1x3x1x16x128xbf16>
    %45 = vector.shape_cast %44 : vector<1x3x1x16x128xbf16> to vector<3x16x128xbf16>
    %46 = tpu.concatenate %45, %43 in 0 : vector<3x16x128xbf16>, vector<1x16x128xbf16> -> vector<4x16x128xbf16>
    %c0_42 = arith.constant 0 : index
    %c0_43 = arith.constant 0 : index
    %c1_44 = arith.constant 1 : index
    %c0_45 = arith.constant 0 : index
    %c0_46 = arith.constant 0 : index
    %47 = vector.load %arg3[%c0_42, %c0_43, %c1_44, %c0_45, %c0_46] : memref<1x1x2x16x128xbf16, #tpu.memory_space<vmem>>, vector<1x1x1x16x128xbf16>
    %48 = vector.shape_cast %47 : vector<1x1x1x16x128xbf16> to vector<1x16x128xbf16>
    %c0_47 = arith.constant 0 : index
    %c1_48 = arith.constant 1 : index
    %c1_49 = arith.constant 1 : index
    %c0_50 = arith.constant 0 : index
    %c0_51 = arith.constant 0 : index
    %49 = vector.load %arg2[%c0_47, %c1_48, %c1_49, %c0_50, %c0_51] : memref<1x4x4x16x128xbf16, #tpu.memory_space<vmem>>, vector<1x3x1x16x128xbf16>
    %50 = vector.shape_cast %49 : vector<1x3x1x16x128xbf16> to vector<3x16x128xbf16>
    %51 = tpu.concatenate %50, %48 in 0 : vector<3x16x128xbf16>, vector<1x16x128xbf16> -> vector<4x16x128xbf16>
    %c6 = arith.constant 6 : index
    %c0_52 = arith.constant 0 : index
    %c0_53 = arith.constant 0 : index
    %52 = vector.load %arg4[%c6, %c0_52, %c0_53] : memref<9x1x128xbf16, #tpu.memory_space<vmem>>, vector<1x1x128xbf16>
    %53 = vector.shape_cast %52 : vector<1x1x128xbf16> to vector<1x128xbf16>
    %54 = vector.shape_cast %53 : vector<1x128xbf16> to vector<1x1x128xbf16>
    %55 = vector.broadcast %54 : vector<1x1x128xbf16> to vector<4x16x128xbf16>
    %56 = arith.mulf %46, %55 : vector<4x16x128xbf16>
    %c7 = arith.constant 7 : index
    %c0_54 = arith.constant 0 : index
    %c0_55 = arith.constant 0 : index
    %57 = vector.load %arg4[%c7, %c0_54, %c0_55] : memref<9x1x128xbf16, #tpu.memory_space<vmem>>, vector<1x1x128xbf16>
    %58 = vector.shape_cast %57 : vector<1x1x128xbf16> to vector<1x128xbf16>
    %59 = vector.shape_cast %58 : vector<1x128xbf16> to vector<1x1x128xbf16>
    %60 = vector.broadcast %59 : vector<1x1x128xbf16> to vector<4x16x128xbf16>
    %61 = arith.mulf %51, %60 : vector<4x16x128xbf16>
    %62 = arith.addf %56, %61 : vector<4x16x128xbf16>
    %63 = arith.addf %35, %62 : vector<4x16x128xbf16>
    %c8 = arith.constant 8 : index
    %c0_56 = arith.constant 0 : index
    %c0_57 = arith.constant 0 : index
    %64 = vector.load %arg4[%c8, %c0_56, %c0_57] : memref<9x1x128xbf16, #tpu.memory_space<vmem>>, vector<1x1x128xbf16>
    %65 = vector.shape_cast %64 : vector<1x1x128xbf16> to vector<1x128xbf16>
    %66 = vector.shape_cast %65 : vector<1x128xbf16> to vector<1x1x128xbf16>
    %67 = vector.broadcast %66 : vector<1x1x128xbf16> to vector<4x16x128xbf16>
    %68 = arith.mulf %46, %67 : vector<4x16x128xbf16>
    %69 = arith.addf %41, %68 : vector<4x16x128xbf16>
    %70 = vector.extract_strided_slice %69 {offsets = [0, 1, 0], sizes = [4, 15, 128], strides = [1, 1, 1]} : vector<4x16x128xbf16> to vector<4x15x128xbf16>
    %cst = arith.constant 0.000000e+00 : bf16
    %71 = vector.broadcast %cst : bf16 to vector<4x1x128xbf16>
    %72 = tpu.concatenate %70, %71 in 1 : vector<4x15x128xbf16>, vector<4x1x128xbf16> -> vector<4x16x128xbf16>
    %73 = arith.addf %63, %72 : vector<4x16x128xbf16>
    %74 = vector.shape_cast %73 : vector<4x16x128xbf16> to vector<64x128xbf16>
    %c0_58 = arith.constant 0 : index
    %c0_59 = arith.constant 0 : index
    %75 = vector.load %arg5[%c0_58, %c0_59] : memref<128x128xbf16, #tpu.memory_space<vmem>>, vector<128x128xbf16>
    %cst_60 = arith.constant dense<0.000000e+00> : vector<64x128xf32>
    %76 = tpu.matmul %74, %75, %cst_60 {dimension_numbers = #tpu.dot_dimension_numbers<[1], [0], [0], [1], [0, 0, 1, 1], [], []>} : vector<64x128xbf16>, vector<128x128xbf16>, vector<64x128xf32> -> vector<64x128xf32>
    %c0_61 = arith.constant 0 : index
    %c0_62 = arith.constant 0 : index
    %77 = vector.load %arg6[%c0_61, %c0_62] : memref<1x128xf32, #tpu.memory_space<vmem>>, vector<1x128xf32>
    %78 = vector.broadcast %77 : vector<1x128xf32> to vector<64x128xf32>
    %79 = arith.addf %76, %78 : vector<64x128xf32>
    %80 = arith.truncf %79 : vector<64x128xf32> to vector<64x128xbf16>
    %c0_63 = arith.constant 0 : index
    %c0_64 = arith.constant 0 : index
    %81 = vector.load %arg7[%c0_63, %c0_64] : memref<128x128xbf16, #tpu.memory_space<vmem>>, vector<128x128xbf16>
    %cst_65 = arith.constant dense<0.000000e+00> : vector<64x128xf32>
    %82 = tpu.matmul %80, %81, %cst_65 {dimension_numbers = #tpu.dot_dimension_numbers<[1], [0], [0], [1], [0, 0, 1, 1], [], []>} : vector<64x128xbf16>, vector<128x128xbf16>, vector<64x128xf32> -> vector<64x128xf32>
    %c0_66 = arith.constant 0 : index
    %c0_67 = arith.constant 0 : index
    %83 = vector.load %arg8[%c0_66, %c0_67] : memref<1x128xf32, #tpu.memory_space<vmem>>, vector<1x128xf32>
    %84 = vector.broadcast %83 : vector<1x128xf32> to vector<64x128xf32>
    %85 = arith.addf %82, %84 : vector<64x128xf32>
    %cst_68 = arith.constant 5.000000e-01 : f32
    %86 = vector.broadcast %cst_68 : f32 to vector<64x128xf32>
    %87 = arith.mulf %86, %85 : vector<64x128xf32>
    %cst_69 = arith.constant 4.471500e-02 : f32
    %88 = vector.broadcast %cst_69 : f32 to vector<64x128xf32>
    %89 = arith.mulf %88, %85 : vector<64x128xf32>
    %90 = arith.mulf %89, %85 : vector<64x128xf32>
    %91 = arith.mulf %90, %85 : vector<64x128xf32>
    %92 = arith.addf %85, %91 : vector<64x128xf32>
    %cst_70 = arith.constant 0.797884583 : f32
    %93 = vector.broadcast %cst_70 : f32 to vector<64x128xf32>
    %94 = arith.mulf %93, %92 : vector<64x128xf32>
    %95 = math.tanh %94 : vector<64x128xf32>
    %cst_71 = arith.constant 1.000000e+00 : f32
    %96 = vector.broadcast %cst_71 : f32 to vector<64x128xf32>
    %97 = arith.addf %96, %95 : vector<64x128xf32>
    %98 = arith.mulf %87, %97 : vector<64x128xf32>
    %99 = arith.truncf %98 : vector<64x128xf32> to vector<64x128xbf16>
    %c0_72 = arith.constant 0 : index
    %c0_73 = arith.constant 0 : index
    %100 = vector.load %arg9[%c0_72, %c0_73] : memref<128x128xbf16, #tpu.memory_space<vmem>>, vector<128x128xbf16>
    %cst_74 = arith.constant dense<0.000000e+00> : vector<64x128xf32>
    %101 = tpu.matmul %99, %100, %cst_74 {dimension_numbers = #tpu.dot_dimension_numbers<[1], [0], [0], [1], [0, 0, 1, 1], [], []>} : vector<64x128xbf16>, vector<128x128xbf16>, vector<64x128xf32> -> vector<64x128xf32>
    %c0_75 = arith.constant 0 : index
    %c0_76 = arith.constant 0 : index
    %102 = vector.load %arg10[%c0_75, %c0_76] : memref<1x128xf32, #tpu.memory_space<vmem>>, vector<1x128xf32>
    %103 = vector.broadcast %102 : vector<1x128xf32> to vector<64x128xf32>
    %104 = arith.addf %101, %103 : vector<64x128xf32>
    %105 = arith.addf %79, %104 : vector<64x128xf32>
    %106 = arith.truncf %105 : vector<64x128xf32> to vector<64x128xbf16>
    %107 = vector.shape_cast %106 : vector<64x128xbf16> to vector<1x4x16x128xbf16>
    %c0_77 = arith.constant 0 : index
    %c0_78 = arith.constant 0 : index
    %c0_79 = arith.constant 0 : index
    %c0_80 = arith.constant 0 : index
    %108 = vector.load %arg11[%c0_77, %c0_78, %c0_79, %c0_80] : memref<1x4x16x128xbf16, #tpu.memory_space<vmem>>, vector<1x4x16x128xbf16>
    tpu.vector_store %arg11[%c0_77, %c0_78, %c0_79, %c0_80], %107 {strides = array<i32>} : memref<1x4x16x128xbf16, #tpu.memory_space<vmem>>, vector<1x4x16x128xbf16>,
    return
  }
  func.func @transform_0(%arg0: i32, %arg1: i32) -> (i32, i32, i32, i32, i32) {
    %c0_i32 = arith.constant 0 : i32
    %c0_i32_0 = arith.constant 0 : i32
    %c0_i32_1 = arith.constant 0 : i32
    %c0_i32_2 = arith.constant 0 : i32
    return %arg0, %arg1, %c0_i32, %c0_i32_0, %c0_i32_1 : i32, i32, i32, i32, i32
  }
  func.func @transform_1(%arg0: i32, %arg1: i32) -> (i32, i32, i32, i32, i32) {
    %c1_i32 = arith.constant 1 : i32
    %0 = arith.addi %arg1, %c1_i32 : i32
    %c4_i32 = arith.constant 4 : i32
    %1 = arith.muli %c4_i32, %0 : i32
    %c0_i32 = arith.constant 0 : i32
    %c0_i32_0 = arith.constant 0 : i32
    %c0_i32_1 = arith.constant 0 : i32
    %c0_i32_2 = arith.constant 0 : i32
    return %arg0, %1, %c0_i32, %c0_i32_0, %c0_i32_1 : i32, i32, i32, i32, i32
  }
  func.func @transform_2(%arg0: i32, %arg1: i32) -> (i32, i32, i32) {
    %c0_i32 = arith.constant 0 : i32
    %c0_i32_0 = arith.constant 0 : i32
    %c0_i32_1 = arith.constant 0 : i32
    %c0_i32_2 = arith.constant 0 : i32
    return %c0_i32, %c0_i32_0, %c0_i32_1 : i32, i32, i32
  }
  func.func @transform_3(%arg0: i32, %arg1: i32) -> (i32, i32) {
    %c0_i32 = arith.constant 0 : i32
    %c0_i32_0 = arith.constant 0 : i32
    %c0_i32_1 = arith.constant 0 : i32
    return %c0_i32, %c0_i32_0 : i32, i32
  }
  func.func @transform_4(%arg0: i32, %arg1: i32) -> (i32, i32) {
    %c0_i32 = arith.constant 0 : i32
    %c0_i32_0 = arith.constant 0 : i32
    %c0_i32_1 = arith.constant 0 : i32
    return %c0_i32, %c0_i32_0 : i32, i32
  }
  func.func @transform_5(%arg0: i32, %arg1: i32) -> (i32, i32) {
    %c0_i32 = arith.constant 0 : i32
    %c0_i32_0 = arith.constant 0 : i32
    %c0_i32_1 = arith.constant 0 : i32
    return %c0_i32, %c0_i32_0 : i32, i32
  }
  func.func @transform_6(%arg0: i32, %arg1: i32) -> (i32, i32) {
    %c0_i32 = arith.constant 0 : i32
    %c0_i32_0 = arith.constant 0 : i32
    %c0_i32_1 = arith.constant 0 : i32
    return %c0_i32, %c0_i32_0 : i32, i32
  }
  func.func @transform_7(%arg0: i32, %arg1: i32) -> (i32, i32) {
    %c0_i32 = arith.constant 0 : i32
    %c0_i32_0 = arith.constant 0 : i32
    %c0_i32_1 = arith.constant 0 : i32
    return %c0_i32, %c0_i32_0 : i32, i32
  }
  func.func @transform_8(%arg0: i32, %arg1: i32) -> (i32, i32) {
    %c0_i32 = arith.constant 0 : i32
    %c0_i32_0 = arith.constant 0 : i32
    %c0_i32_1 = arith.constant 0 : i32
    return %c0_i32, %c0_i32_0 : i32, i32
  }
  func.func @transform_9(%arg0: i32, %arg1: i32) -> (i32, i32, i32, i32) {
    %c0_i32 = arith.constant 0 : i32
    %c0_i32_0 = arith.constant 0 : i32
    %c0_i32_1 = arith.constant 0 : i32
    return %arg0, %arg1, %c0_i32, %c0_i32_0 : i32, i32, i32, i32
  }
}

</mosaic_0001>

<bundles_post_ra>
// kernel: repvit_block_pallas.1
= control target key start
LH: loop header
LB: loop body
LE: loop exit
PB: predicated region body
PF: predicated region fallthrough
CT: control target
= control target key end

     0   :  { %s1986_s30 = smov 0   ;;  %s1988_s10 = smov 0   ;;  %s2420_s0 = inlined_call_operand.vmem [shape: bf16[2,9,4,16,128], index: 0, kind: input, shape index: {}, may-alias: {0,1}]   ;;  %s2421_s1 = inlined_call_operand.vmem [shape: bf16[2,9,4,16,128], index: 1, kind: input, shape index: {}, may-alias: {0,1}]   ;;  %s2422_s2 = inlined_call_operand.vmem [shape: bf16[9,1,128], index: 2, kind: input, shape index: {}]   ;;  %s2423_s3 = inlined_call_operand.vmem [shape: bf16[128,128], index: 3, kind: input, shape index: {}]   ;;  %s2424_s4 = inlined_call_operand.vmem [shape: f32[1,128], index: 4, kind: input, shape index: {}]   ;;  %s2425_s5 = inlined_call_operand.vmem [shape: bf16[128,128], index: 5, kind: input, shape index: {}]   ;;  %s2426_s6 = inlined_call_operand.vmem [shape: f32[1,128], index: 6, kind: input, shape index: {}]   ;;  %s2427_s7 = inlined_call_operand.vmem [shape: bf16[128,128], index: 7, kind: input, shape index: {}]   ;;  %s2428_s8 = inlined_call_operand.vmem [shape: f32[1,128], index: 8, kind: input, shape index: {}]   ;;  %s2429_s9 = inlined_call_operand.vmem [shape: bf16[2,8,16,128], index: 9, kind: output, shape index: {}]  }
   0x1   :  { %s1990_s11 = smov 0   ;;  %s1992_s12 = smov 0  }
   0x2   :  { %s1994_s13 = smov 0  }
   0x3 LB: > { %s28_s14 = sadd.s32 1, %s1926_s11  ;;  %s31_s15 = sadd.s32 1, %s1930_s12  ;;  %s1934_s13 = sphi %s1994_s13, %s19_s13   ;;  %s1930_s12 = sphi %s1992_s12, %s2436_s12   ;;  %s1926_s11 = sphi %s1990_s11, %s2435_s11   ;;  %s1922_s10 = sphi %s1988_s10, %s2434_s10   ;;  %s1918_s30 = sphi %s1986_s30, %s2433_s30  }
   0x4   : > { %p29_p0 = scmp.ge.s32.totalorder %s28_s14, 2  ;;  %p1535_p1 = scmp.ge.s32.totalorder %s1934_s13, 1 }
   0x5   : > { %p345_p2 = scmp.lt.s32.totalorder %s1934_s13, 5 }
   0x6   : > { %s2438_s14 = smov (%p29_p0, %s28_s14), 0  ;;  %s2440_s15 = smov (!%p29_p0, %s31_s15), %s1930_s12 }
   0x7   : > { %p346_p3 = pnand %p1535_p1, %p345_p2  ;;  %p33_p4 = scmp.ge.s32.totalorder %s2440_s15, 2 }
   0x8   : > { %v1856_v0 = vld [vmem:[%s2423_s3] sm:$0xff] (!%p346_p3)   ;;  %s2019_s18 = sshll.u32 (!%p346_p3), %s1918_s30, 2  ;;  %v1857_v1 = vld [vmem:[%s2423_s3 + $0x8] sm:$0xff] (!%p346_p3)   ;;  %p415_p5 = scmp.lt.s32.totalorder (!%p346_p3), %s1922_s10, 1  ;;  %v477_v2 = vlaneseq (!%p346_p3)  ;;  %v1858_v3 = vld [vmem:[%s2423_s3 + $0x10] sm:$0xff] (!%p346_p3)   ;;  %vm806_vm0 = vcmask (!%p346_p3), 1047552  }
   0x9   : > { %s2442_s15 = smov (%p33_p4, %s2440_s15), 0  ;;  %349 = sbr.rel (%p346_p3) target bundleno = 764 (0x2fc), region = 56 }
   0xa   : > { %1727 = vmatprep.subr.bf16.mxu0 (!%p346_p3), %v1856_v0  ;;  %p417_p6 = scmp.lt.s32.totalorder (!%p346_p3), %s2019_s18, 8  ;;  %v478_v4 = vshrl.u32 (!%p346_p3), %v477_v2, 7  ;;  %v1859_v5 = vld [vmem:[%s2423_s3 + $0x18] sm:$0xff] (!%p346_p3)   ;;  %v473_v6 = vld [vmem:[%s2422_s2] sm:$0x1] (!%p346_p3)  ;;  %v1861_v35 = vld [vmem:[%s2423_s3 + $0x28] sm:$0xff] (!%p346_p3)  }
   0xb   : > { %1728 = vmatpush3.bf16.msra.mxu0 (!%p346_p3), %v1856_v0  ;;  %v1555_v7 = vld [vmem:[%s2422_s2 + $0x1] sm:$0x1] (!%p346_p3)  ;;  %v475_v8 = vpack.i.b16 (!%p346_p3), %v473_v6, %v473_v6  ;;  %v1557_v11 = vld [vmem:[%s2422_s2 + $0x2] sm:$0x1] (!%p346_p3)  ;;  %v1575_v12 = vld [vmem:[%s2422_s2 + $0x3] sm:$0x1] (!%p346_p3) }
   0xc   : > { %1729 = vmatprep.subr.bf16.mxu0 (!%p346_p3), %v1857_v1  ;;  %v479_v9 = vsub.s32 (!%p346_p3), 0, %v478_v4  ;;  %v496_v10 = vpack.i.b16 (!%p346_p3), %v1555_v7, %v1555_v7  ;;  %v525_v13 = vpack.i.b16 (!%p346_p3), %v1557_v11, %v1557_v11  ;;  %v564_v14 = vpack.i.b16 (!%p346_p3), %v1575_v12, %v1575_v12  ;;  %v1860_v17 = vld [vmem:[%s2423_s3 + $0x20] sm:$0xff] (!%p346_p3)   ;;  %v1599_v34 = vld [vmem:[%s2422_s2 + $0x8] sm:$0x1] (!%p346_p3)  ;;  %v1862_v54 = vld [vmem:[%s2423_s3 + $0x30] sm:$0xff] (!%p346_p3)   ;;  %p447_p8 = scmp.lt.s32.totalorder (!%p346_p3), %s2019_s18, 7 }
   0xd   : > { %v1577_v20 = vld [vmem:[%s2422_s2 + $0x4] sm:$0x1] (!%p346_p3)  ;;  %v1579_v25 = vld [vmem:[%s2422_s2 + $0x5] sm:$0x1] (!%p346_p3)  ;;  %v1595_v32 = vld [vmem:[%s2422_s2 + $0x6] sm:$0x1] (!%p346_p3)  ;;  %v728_v49 = vpack.i.b16 (!%p346_p3), %v1599_v34, %v1599_v34 }
   0xe   : > { %v480_v15 = vrot.slane (!%p346_p3), %v475_v8, %v479_v9  ;;  %v501_v16 = vrot.slane (!%p346_p3), %v496_v10, %v479_v9  ;;  %v530_v18 = vrot.slane (!%p346_p3), %v525_v13, %v479_v9  ;;  %v569_v19 = vrot.slane (!%p346_p3), %v564_v14, %v479_v9  ;;  %v1597_v33 = vld [vmem:[%s2422_s2 + $0x7] sm:$0x1] (!%p346_p3)  ;;  %v1863_v11 = vld [vmem:[%s2423_s3 + $0x38] sm:$0xff] (!%p346_p3)  }
   0xf   : > { %1730 = vmatpush3.bf16.msra.mxu0 (!%p346_p3), %v1857_v1  ;;  %v585_v24 = vpack.i.b16 (!%p346_p3), %v1577_v20, %v1577_v20  ;;  %v622_v30 = vpack.i.b16 (!%p346_p3), %v1579_v25, %v1579_v25  ;;  %v670_v47 = vpack.i.b16 (!%p346_p3), %v1595_v32, %v1595_v32  ;;  %v691_v48 = vpack.i.b16 (!%p346_p3), %v1597_v33, %v1597_v33  ;;  %v1865_v33 = vld [vmem:[%s2425_s5 + $0x8] sm:$0xff] (!%p346_p3)  }
  0x10   : > { %s2444_s10 = smov (!%p415_p5, %s1922_s10), 1  ;;  %1731 = vmatprep.subr.bf16.mxu0 %v1858_v3  ;;  %v2061_v22 = vcombine.low %v480_v15, %v480_v15  ;;  %v2063_v23 = vcombine.low %v501_v16, %v501_v16  ;;  %v2071_v29 = vcombine.low %v530_v18, %v530_v18  ;;  %v2073_v31 = vcombine.low %v569_v19, %v569_v19 }
  0x11   : > { %s418_s23 = scalar_select %p417_p6, %s2019_s18, 8  ;;  %v590_v41 = vrot.slane %v585_v24, %v479_v9  ;;  %v627_v42 = vrot.slane %v622_v30, %v479_v9  ;;  %v675_v56 = vrot.slane %v670_v47, %v479_v9  ;;  %v696_v57 = vrot.slane %v691_v48, %v479_v9 }
  0x12   : > { %s1815_s24 = smul.u32 72, %s2444_s10  ;;  %v733_v58 = vrot.slane %v728_v49, %v479_v9  ;;  %vm807_vm1 = vsmask.f32 7424 }
  0x13   : > { %s1537_s25 = sshll.u32 %s418_s23, 3  ;;  %1732 = vmatpush3.bf16.msra.mxu0 %v1858_v3  ;;  %v2098_v52 = vcombine.low %v590_v41, %v590_v41  ;;  %v2100_v53 = vcombine.low %v627_v42, %v627_v42  ;;  %v2114_v3 = vcombine.low %v675_v56, %v675_v56  ;;  %v2116_v4 = vcombine.low %v696_v57, %v696_v57  ;;  %vm2207_vm2 = vmand %vm806_vm0, %vm807_vm1 }
  0x14   : > { %s421_s26 = sadd.s32 %s1815_s24, %s1537_s25  ;;  %1733 = vmatprep.subr.bf16.mxu0 %v1859_v5 }
  0x15   : > { %s1538_s29 = sshll.u32 %s421_s26, 2 }
  0x16   : > { %s2052_s27 = scalar_lea.vmem %s2420_s0, %s1538_s29  ;;  %s1659_s29 = sadd.s32 4, %s2019_s18 }
  0x17   : > { %v456_v21 = vld [vmem:[%s2052_s27] sm:$0xf]  ;;  %v457_v26 = vld [vmem:[%s2052_s27 + $0x4] sm:$0xf]  ;;  %v1546_v27 = vld [vmem:[%s2052_s27 + $0x8] sm:$0xf]  ;;  %1734 = vmatpush3.bf16.msra.mxu0 %v1859_v5  ;;  %v2118_v5 = vcombine.low %v733_v58, %v733_v58 }
  0x18   : > { %v1547_v28 = vld [vmem:[%s2052_s27 + $0xc] sm:$0xf]  ;;  %1735 = vmatprep.subr.bf16.mxu0 %v1860_v17  ;;  %v485_v36 = vmul.bf16 %v2061_v22, %v456_v21  ;;  %v486_v37 = vmul.bf16 %v2061_v22, %v457_v26  ;;  %v506_v38 = vmul.bf16 %v2063_v23, %v1546_v27  ;;  %v1559_v40 = vld [vmem:[%s2052_s27 + $0x10] sm:$0xf]  ;;  %v535_v43 = vmul.bf16 %v2071_v29, %v456_v21  ;;  %v1560_v44 = vld [vmem:[%s2052_s27 + $0x14] sm:$0xf] }
  0x19   : > { %v507_v39 = vmul.bf16 %v2063_v23, %v1547_v28  ;;  %v1567_v45 = vld [vmem:[%s2052_s27 + $0x18] sm:$0xf]  ;;  %v1568_v46 = vld [vmem:[%s2052_s27 + $0x1c] sm:$0xf]  ;;  %v536_v50 = vmul.bf16 %v2071_v29, %v457_v26  ;;  %v574_v51 = vmul.bf16 %v2073_v31, %v1559_v40  ;;  %v575_v55 = vmul.bf16 %v2073_v31, %v1560_v44  ;;  %v1589_v63 = vld [vmem:[%s2052_s27 + $0x28] sm:$0xf] }
  0x1a   : > { %v595_v59 = vmul.bf16 %v2098_v52, %v1567_v45  ;;  %v596_v60 = vmul.bf16 %v2098_v52, %v1568_v46  ;;  %v632_v61 = vmul.bf16 %v2100_v53, %v1559_v40  ;;  %v633_v62 = vmul.bf16 %v2100_v53, %v1560_v44  ;;  %v1581_v0 = vld [vmem:[%s2052_s27 + $0x20] sm:$0xf]  ;;  %v1582_v1 = vld [vmem:[%s2052_s27 + $0x24] sm:$0xf]  ;;  %v1590_v2 = vld [vmem:[%s2052_s27 + $0x2c] sm:$0xf] }
  0x1b   : > { %1736 = vmatpush3.bf16.msra.mxu0 %v1860_v17  ;;  %v2120_v6 = vadd.bf16 %v506_v38, %v485_v36  ;;  %v1548_v10 = vld [vmem:[%s2052_s27 + $0x28] sm:$0xf]  ;;  %v2129_v12 = vadd.bf16 %v507_v39, %v486_v37  ;;  %v680_v14 = vmul.bf16 %v2114_v3, %v1581_v0  ;;  %v701_v15 = vmul.bf16 %v2116_v4, %v1589_v63  ;;  %v1549_v16 = vld [vmem:[%s2052_s27 + $0x2c] sm:$0xf]  ;;  %v1864_v17 = vld [vmem:[%s2425_s5] sm:$0xff]   ;;  %p2152_p7 = scmp.lt.s32.totalorder %s1659_s29, 8 }
  0x1c   : > { %1737 = vmatprep.subr.bf16.mxu0 %v1861_v35  ;;  %v2122_v7 = vadd.bf16 %v595_v59, %v574_v51  ;;  %v640_v8 = vadd.bf16 %v632_v61, %v535_v43  ;;  %v641_v9 = vadd.bf16 %v633_v62, %v536_v50  ;;  %v2131_v13 = vadd.bf16 %v596_v60, %v575_v55  ;;  %v458_v24 = vld [vmem:[%s2052_s27 + $0x20] sm:$0xf]  ;;  %v459_v25 = vld [vmem:[%s2052_s27 + $0x24] sm:$0xf]  ;;  %v1561_v26 = vld [vmem:[%s2052_s27 + $0x30] sm:$0xf] }
  0x1d   : > { %v681_v18 = vmul.bf16 %v2114_v3, %v1582_v1  ;;  %v702_v19 = vmul.bf16 %v2116_v4, %v1590_v2  ;;  %v738_v20 = vmul.bf16 %v2118_v5, %v1581_v0  ;;  %v739_v21 = vmul.bf16 %v2118_v5, %v1582_v1  ;;  %v1562_v32 = vld [vmem:[%s2052_s27 + $0x34] sm:$0xf]  ;;  %1751 = vmatprep.subr.bf16.mxu1 %v1864_v17  ;;  %v1569_v38 = vld [vmem:[%s2052_s27 + $0x38] sm:$0xf]  ;;  %v1570_v39 = vld [vmem:[%s2052_s27 + $0x3c] sm:$0xf] }
  0x1e   : > { %v487_v27 = vmul.bf16 %v2061_v22, %v458_v24  ;;  %v488_v28 = vmul.bf16 %v2061_v22, %v459_v25  ;;  %v508_v30 = vmul.bf16 %v2063_v23, %v1548_v10  ;;  %v611_v34 = vadd.bf16 %v2122_v7, %v2120_v6  ;;  %v1583_v44 = vld [vmem:[%s2052_s27 + $0x40] sm:$0xf]  ;;  %v1591_v45 = vld [vmem:[%s2052_s27 + $0x48] sm:$0xf]  ;;  %1752 = vmatpush3.bf16.msra.mxu1 %v1864_v17  ;;  %v2177_v56 = vld [vmem:[%s2052_s27 + $0x44] sm:$0xf] }
  0x1f   : > { %1738 = vmatpush3.bf16.msra.mxu0 %v1861_v35  ;;  %v746_v35 = vadd.bf16 %v738_v20, %v640_v8  ;;  %v747_v36 = vadd.bf16 %v739_v21, %v641_v9  ;;  %v509_v37 = vmul.bf16 %v2063_v23, %v1549_v16  ;;  %v612_v40 = vadd.bf16 %v2131_v13, %v2129_v12  ;;  %v2180_v57 = vld [vmem:[%s2052_s27 + $0x4c] sm:$0xf]  ;;  %s2446_s29 = smov (!%p2152_p7, %s1659_s29), 8  ;;  %v1866_v58 = vld [vmem:[%s2425_s5 + $0x10] sm:$0xff]   ;;  %v2194_v63 = vld [vmem:[%s2052_s27 + $0x48] sm:$0xf] }
  0x20   : > { %1739 = vmatprep.subr.bf16.mxu0 %v1862_v54  ;;  %v709_v41 = vadd.bf16 %v701_v15, %v680_v14  ;;  %v537_v42 = vmul.bf16 %v2071_v29, %v458_v24  ;;  %v538_v43 = vmul.bf16 %v2071_v29, %v459_v25  ;;  %v710_v46 = vadd.bf16 %v702_v19, %v681_v18  ;;  %v460_v7 = vld [vmem:[%s2052_s27 + $0x40] sm:$0xf]  ;;  %v2202_v8 = vld [vmem:[%s2052_s27 + $0x44] sm:$0xf]  ;;  %v1551_v9 = vld [vmem:[%s2052_s27 + $0x4c] sm:$0xf] }
  0x21   : > { %v1601_v47 = vcombine.low %v746_v35, %v747_v36  ;;  %v576_v48 = vmul.bf16 %v2073_v31, %v1561_v26  ;;  %v634_v49 = vmul.bf16 %v2100_v53, %v1561_v26  ;;  %v577_v50 = vmul.bf16 %v2073_v31, %v1562_v32  ;;  %1753 = vmatprep.subr.bf16.mxu1 %v1865_v33  ;;  %v1563_v19 = vld [vmem:[%s2052_s27 + $0x50] sm:$0xf]  ;;  %v1571_v20 = vld [vmem:[%s2052_s27 + $0x58] sm:$0xf]  ;;  %v1572_v21 = vld [vmem:[%s2052_s27 + $0x5c] sm:$0xf] }
  0x22   : > { %v597_v51 = vmul.bf16 %v2098_v52, %v1569_v38  ;;  %v635_v55 = vmul.bf16 %v2100_v53, %v1562_v32  ;;  %v682_v61 = vmul.bf16 %v2114_v3, %v1583_v44  ;;  %v703_v62 = vmul.bf16 %v2116_v4, %v1591_v45  ;;  %1754 = vmatpush3.bf16.msra.mxu1 %v1865_v33  ;;  %s1540_s16 = sshll.u32 %s2446_s29, 3  ;;  %v1867_v24 = vld [vmem:[%s2425_s5 + $0x18] sm:$0xff]   ;;  %v1564_v35 = vld [vmem:[%s2052_s27 + $0x54] sm:$0xf]  ;;  %s2448_s18 = smov (!%p447_p8, %s2019_s18), 7 }
  0x23   : > { %1740 = vmatpush3.bf16.msra.mxu0 %v1862_v54  ;;  %v598_v54 = vmul.bf16 %v2098_v52, %v1570_v39  ;;  %v775_v59 = vshrl.u32 %v1601_v47, 16  ;;  %v777_v60 = vshll.u32 %v1601_v47, 16  ;;  %v2196_v0 = vadd.bf16 %v508_v30, %v487_v27  ;;  %1755 = vmatprep.subr.bf16.mxu1 %v1866_v58  ;;  %s2263_s22 = sadd.s32 %s1815_s24, %s1540_s16  ;;  %s1544_s29 = sshll.u32 %s2444_s10, 4 }
  0x24   : > { %1741 = vmatprep.subr.bf16.mxu0 %v1863_v11  ;;  %v2198_v1 = vadd.bf16 %v509_v37, %v488_v28  ;;  %v642_v2 = vadd.bf16 %v634_v49, %v537_v42  ;;  %v643_v6 = vadd.bf16 %v635_v55, %v538_v43  ;;  %v717_v10 = vadd.bf16 %v709_v41, %v611_v34  ;;  %v1585_v49 = vld [vmem:[%s2052_s27 + $0x60] sm:$0xf]  ;;  %s1541_s24 = sshll.u32 %s2263_s22, 2 }
  0x25   : > { %v779_v12 = vrot.slane %v777_v60, 1  ;;  %v740_v14 = vmul.bf16 %v2118_v5, %v1583_v44  ;;  %v2212_v15 = vadd.bf16 %v597_v51, %v576_v48  ;;  %v2214_v16 = vadd.bf16 %v598_v54, %v577_v50  ;;  %v2251_v50 = vld [vmem:[%s2052_s27 + $0x64] sm:$0xf]  ;;  %s2294_s28 = scalar_lea.vmem %s2421_s1, %s1541_s24  ;;  %s1543_s24 = sshll.u32 %s2448_s18, 1 }
  0x26   : > { %v683_v17 = vmul.bf16 %v2114_v3, %v2177_v56  ;;  %v741_v18 = vmul.bf16 %v2118_v5, %v2177_v56  ;;  %v704_v26 = vmul.bf16 %v2116_v4, %v2180_v57  ;;  %v711_v27 = vadd.bf16 %v703_v62, %v682_v61  ;;  %1756 = vmatpush3.bf16.msra.mxu1 %v1866_v58 }
  0x27   : > { %1742 = vmatpush3.bf16.msra.mxu0 %v1863_v11  ;;  %v718_v11 = vadd.bf16 %v710_v46, %v612_v40  ;;  %v780_v25 = vor.u32 %v779_v12, %v775_v59  ;;  %v748_v28 = vadd.bf16 %v740_v14, %v642_v2  ;;  %v489_v32 = vmul.bf16 %v2061_v22, %v460_v7  ;;  %v1868_v40 = vld [vmem:[%s2425_s5 + $0x20] sm:$0xff]   ;;  %v1593_v2 = vld [vmem:[%s2052_s27 + $0x68] sm:$0xf] }
  0x28   : > { %v749_v30 = vadd.bf16 %v741_v18, %v643_v6  ;;  %v490_v33 = vmul.bf16 %v2061_v22, %v2202_v8  ;;  %v510_v34 = vmul.bf16 %v2063_v23, %v2194_v63  ;;  %v511_v37 = vmul.bf16 %v2063_v23, %v1551_v9  ;;  %1757 = vmatprep.subr.bf16.mxu1 %v1867_v24 }
  0x29   : > { %v809_v36 = vsel %vm2207_vm2, %v780_v25, 0  ;;  %v539_v38 = vmul.bf16 %v2071_v29, %v460_v7  ;;  %v540_v39 = vmul.bf16 %v2071_v29, %v2202_v8  ;;  %v578_v44 = vmul.bf16 %v2073_v31, %v1563_v19 }
  0x2a   : > { %v1605_v41 = vcombine.low %v809_v36, %v809_v36  ;;  %v1606_v42 = vcombine.high %v809_v36, %v809_v36  ;;  %v1602_v43 = vcombine.low %v748_v28, %v749_v30  ;;  %v579_v45 = vmul.bf16 %v2073_v31, %v1564_v35  ;;  %1758 = vmatpush3.bf16.msra.mxu1 %v1867_v24  ;;  %v462_v24 = vld [vmem:[%s2052_s27 + $0x60] sm:$0xf]  ;;  %v463_v30 = vld [vmem:[%s2052_s27 + $0x64] sm:$0xf]  ;;  %v1565_v36 = vld [vmem:[%s2052_s27 + $0x70] sm:$0xf] }
  0x2b   : > { %v599_v46 = vmul.bf16 %v2098_v52, %v1571_v20  ;;  %v600_v47 = vmul.bf16 %v2098_v52, %v1572_v21  ;;  %v636_v48 = vmul.bf16 %v2100_v53, %v1563_v19  ;;  %v613_v57 = vadd.bf16 %v2212_v15, %v2196_v0  ;;  %1759 = vmatprep.subr.bf16.mxu1 %v1868_v40  ;;  %v1869_v0 = vld [vmem:[%s2425_s5 + $0x28] sm:$0xff]  }
  0x2c   : > { %v841_v51 = vadd.bf16 %v1605_v41, %v717_v10  ;;  %v842_v54 = vadd.bf16 %v1606_v42, %v718_v11  ;;  %v782_v55 = vshrl.u32 %v1602_v43, 16  ;;  %v784_v56 = vshll.u32 %v1602_v43, 16  ;;  %v1594_v11 = vld [vmem:[%s2052_s27 + $0x6c] sm:$0xf]  ;;  %v1566_v42 = vld [vmem:[%s2052_s27 + $0x74] sm:$0xf] }
  0x2d   : > { %v614_v58 = vadd.bf16 %v2214_v16, %v2198_v1  ;;  %v712_v59 = vadd.bf16 %v704_v26, %v683_v17  ;;  %v637_v60 = vmul.bf16 %v2100_v53, %v1564_v35  ;;  %v644_v63 = vadd.bf16 %v636_v48, %v539_v38  ;;  %v1552_v35 = vld [vmem:[%s2052_s27 + $0x68] sm:$0xf] }
  0x2e   : > { %v1614_v61 = vcombine.low %v841_v51, %v842_v54  ;;  %v786_v62 = vrot.slane %v784_v56, 1  ;;  %v2268_v1 = vadd.bf16 %v510_v34, %v489_v32  ;;  %v2270_v6 = vadd.bf16 %v511_v37, %v490_v33  ;;  %1760 = vmatpush3.bf16.msra.mxu1 %v1868_v40  ;;  %v1553_v40 = vld [vmem:[%s2052_s27 + $0x6c] sm:$0xf]  ;;  %v1574_v51 = vld [vmem:[%s2052_s27 + $0x7c] sm:$0xf] }
  0x2f   : > { %v2272_v7 = vadd.bf16 %v599_v46, %v578_v44  ;;  %v645_v8 = vadd.bf16 %v637_v60, %v540_v39  ;;  %v608_v10 = vadd.bf16 %v600_v47, %v579_v45  ;;  %v742_v12 = vmul.bf16 %v2118_v5, %v1585_v49  ;;  %1761 = vmatprep.subr.bf16.mxu1 %v1869_v0  ;;  %v1573_v47 = vld [vmem:[%s2052_s27 + $0x78] sm:$0xf]  ;;  %v649_v60 = vld [vmem:[%s2294_s28 + $0x4] sm:$0xf]  ;;  %s451_s27 = sadd.s32 %s1544_s29, %s1543_s24 }
  0x30   : > { %1743 = vmatprep.mubr.bf16.mxu0 %v1614_v61  ;;  %v787_v9 = vor.u32 %v786_v62, %v782_v55  ;;  %v743_v14 = vmul.bf16 %v2118_v5, %v2251_v50  ;;  %v719_v15 = vadd.bf16 %v711_v27, %v613_v57  ;;  %v720_v16 = vadd.bf16 %v712_v59, %v614_v58  ;;  %v648_v55 = vld [vmem:[%s2294_s28] sm:$0xf]  ;;  %s1545_s30 = sshll.u32 %s451_s27, 2 }
  0x31   : > { %v684_v17 = vmul.bf16 %v2114_v3, %v1585_v49  ;;  %v705_v18 = vmul.bf16 %v2116_v4, %v1593_v2  ;;  %v750_v20 = vadd.bf16 %v742_v12, %v644_v63  ;;  %v685_v27 = vmul.bf16 %v2114_v3, %v2251_v50  ;;  %s453_s16 = scalar_lea.vmem %s2429_s9, %s1545_s30 }
  0x32   : > { %v810_v19 = vsel %vm2207_vm2, %v787_v9, 0  ;;  %v751_v21 = vadd.bf16 %v743_v14, %v645_v8  ;;  %v706_v28 = vmul.bf16 %v2116_v4, %v1594_v11  ;;  %v615_v32 = vadd.bf16 %v2272_v7, %v2268_v1  ;;  %1762 = vmatpush3.bf16.msra.mxu1 %v1869_v0  ;;  %v1587_v8 = vld [vmem:[%s2294_s28 + $0x8] sm:$0xf] }
  0x33   : > { %v1607_v25 = vcombine.low %v810_v19, %v810_v19  ;;  %v1608_v26 = vcombine.high %v810_v19, %v810_v19  ;;  %v616_v33 = vadd.bf16 %v608_v10, %v2270_v6  ;;  %v713_v39 = vadd.bf16 %v705_v18, %v684_v17 }
  0x34   : > { %v1603_v34 = vcombine.low %v750_v20, %v751_v21  ;;  %v541_v41 = vmul.bf16 %v2071_v29, %v462_v24  ;;  %v491_v45 = vmul.bf16 %v2061_v22, %v462_v24  ;;  %v542_v46 = vmul.bf16 %v2071_v29, %v463_v30 }
  0x35   : > { %v843_v37 = vadd.bf16 %v1607_v25, %v719_v15  ;;  %v844_v38 = vadd.bf16 %v1608_v26, %v720_v16  ;;  %v714_v49 = vadd.bf16 %v706_v28, %v685_v27  ;;  %v512_v50 = vmul.bf16 %v2063_v23, %v1552_v35 }
  0x36   : > { %v789_v43 = vshrl.u32 %v1603_v34, 16  ;;  %v791_v44 = vshll.u32 %v1603_v34, 16  ;;  %v638_v54 = vmul.bf16 %v2100_v53, %v1565_v36  ;;  %v492_v57 = vmul.bf16 %v2061_v22, %v463_v30 }
  0x37   : > { %v1615_v48 = vcombine.low %v843_v37, %v844_v38  ;;  %v513_v58 = vmul.bf16 %v2063_v23, %v1553_v40  ;;  %v639_v59 = vmul.bf16 %v2100_v53, %v1566_v42  ;;  %v580_v29 = vmul.bf16 %v2073_v31, %v1565_v36  ;;  %v1588_v53 = vld [vmem:[%s2294_s28 + $0xc] sm:$0xf] }
  0x38   : > { %v793_v56 = vrot.slane %v791_v44, 1  ;;  %v581_v61 = vmul.bf16 %v2073_v31, %v1566_v42  ;;  %v601_v62 = vmul.bf16 %v2098_v52, %v1573_v47  ;;  %v646_v63 = vadd.bf16 %v638_v54, %v541_v41  ;;  %v1870_v42 = vld [vmem:[%s2425_s5 + $0x30] sm:$0xff]   ;;  %v1613_v44 = vld [vmem:[%s2424_s4] ss:$0 sm:$0xff] }
  0x39   : > { %1744 = vmatmul.mubr.bf16.vlgmr.msra.gmra.mrb[0].mxu0 %v1615_v48  ;;  %v602_v0 = vmul.bf16 %v2098_v52, %v1574_v51  ;;  %v647_v1 = vadd.bf16 %v639_v59, %v542_v46  ;;  %v744_v22 = vmul.bf16 %v2118_v5, %v648_v55  ;;  %v721_v6 = vadd.bf16 %v713_v39, %v615_v32 }
  0x3a   : > { %v794_v2 = vor.u32 %v793_v56, %v789_v43  ;;  %v722_v23 = vadd.bf16 %v714_v49, %v616_v33  ;;  %v520_v7 = vadd.bf16 %v512_v50, %v491_v45  ;;  %v745_v9 = vmul.bf16 %v2118_v5, %v649_v60  ;;  %1763 = vmatprep.subr.bf16.mxu1 %v1870_v42  ;;  %v1871_v43 = vld [vmem:[%s2425_s5 + $0x38] sm:$0xff]  }
  0x3b   : > { %v521_v31 = vadd.bf16 %v513_v58, %v492_v57  ;;  %v686_v11 = vmul.bf16 %v2114_v3, %v648_v55  ;;  %v752_v12 = vadd.bf16 %v744_v22, %v646_v63  ;;  %v687_v52 = vmul.bf16 %v2114_v3, %v649_v60  ;;  %1764 = vmatpush3.bf16.msra.mxu1 %v1870_v42  ;;  %v1874_v22 = vld [vmem:[%s2427_s7 + $0x10] sm:$0xff]  }
  0x3c   : > { %v811_v10 = vsel %vm2207_vm2, %v794_v2, 0  ;;  %v753_v16 = vadd.bf16 %v745_v9, %v647_v1  ;;  %v609_v17 = vadd.bf16 %v601_v62, %v580_v29  ;;  %v610_v18 = vadd.bf16 %v602_v0, %v581_v61  ;;  %1765 = vmatprep.subr.bf16.mxu1 %v1871_v43  ;;  %v1872_v0 = vld [vmem:[%s2427_s7] sm:$0xff]   ;;  %v1873_v1 = vld [vmem:[%s2427_s7 + $0x8] sm:$0xff]  }
  0x3d   : > { %v1609_v14 = vcombine.low %v811_v10, %v811_v10  ;;  %v1610_v15 = vcombine.high %v811_v10, %v811_v10  ;;  %v707_v19 = vmul.bf16 %v2116_v4, %v1587_v8  ;;  %v708_v20 = vmul.bf16 %v2116_v4, %v1588_v53  ;;  %1775 = vmatprep.subr.bf16.mxu0 %v1872_v0  ;;  %v1878_v8 = vld [vmem:[%s2427_s7 + $0x30] sm:$0xff]   ;;  %v1879_v53 = vld [vmem:[%s2427_s7 + $0x38] sm:$0xff]   ;;  %v1626_v9 = vld [vmem:[%s2426_s6] ss:$0 sm:$0xff] }
  0x3e   : > { %v1604_v24 = vcombine.low %v752_v12, %v753_v16  ;;  %v617_v28 = vadd.bf16 %v609_v17, %v520_v7  ;;  %v618_v30 = vadd.bf16 %v610_v18, %v521_v31  ;;  %1776 = vmatpush3.bf16.msra.mxu0 %v1872_v0  ;;  %v1877_v7 = vld [vmem:[%s2427_s7 + $0x28] sm:$0xff]  }
  0x3f   : > { %v845_v21 = vadd.bf16 %v1609_v14, %v721_v6  ;;  %v846_v5 = vadd.bf16 %v1610_v15, %v722_v23  ;;  %v715_v32 = vadd.bf16 %v707_v19, %v686_v11  ;;  %v716_v33 = vadd.bf16 %v708_v20, %v687_v52  ;;  %1766 = vmatpush3.bf16.msra.mxu1 %v1871_v43  ;;  %v1875_v6 = vld [vmem:[%s2427_s7 + $0x18] sm:$0xff]   ;;  %v1876_v23 = vld [vmem:[%s2427_s7 + $0x20] sm:$0xff]  }
  0x40   : > { %v796_v26 = vshrl.u32 %v1604_v24, 16  ;;  %v798_v27 = vshll.u32 %v1604_v24, 16  ;;  %1799 = vmatprep.subr.bf16.mxu1 %v1872_v0  ;;  %1777 = vmatprep.subr.bf16.mxu0 %v1873_v1 }
  0x41   : > { %v1616_v25 = vcombine.low %v845_v21, %v846_v5  ;;  %v723_v35 = vadd.bf16 %v715_v32, %v617_v28  ;;  %v724_v36 = vadd.bf16 %v716_v33, %v618_v30 }
  0x42   : > { %v800_v34 = vrot.slane %v798_v27, 1  ;;  %1778 = vmatpush3.bf16.msra.mxu0 %v1873_v1 }
  0x43   : > { %1747 = vmatprep.mubr.bf16.mxu0 %v1616_v25  ;;  %1779 = vmatprep.subr.bf16.mxu0 %v1874_v22 }
  0x44   : > { %v801_v3 = vor.u32 %v800_v34, %v796_v26 }
  0x46   : > { %v812_v37 = vsel %vm2207_vm2, %v801_v3, 0  ;;  %1780 = vmatpush3.bf16.msra.mxu0 %v1874_v22 }
  0x47   : > { %v1611_v38 = vcombine.low %v812_v37, %v812_v37  ;;  %v1612_v4 = vcombine.high %v812_v37, %v812_v37  ;;  %1781 = vmatprep.subr.bf16.mxu0 %v1875_v6 }
  0x49   : > { %v847_v39 = vadd.bf16 %v1611_v38, %v723_v35  ;;  %v848_v40 = vadd.bf16 %v1612_v4, %v724_v36 }
  0x4a   : > { %1782 = vmatpush3.bf16.msra.mxu0 %v1875_v6 }
  0x4b   : > { %v1617_v41 = vcombine.low %v847_v39, %v848_v40  ;;  %1783 = vmatprep.subr.bf16.mxu0 %v1876_v23 }
  0x4d   : > { %1748 = vmatmul.mubr.bf16.gmra.mrb[4].mxu0 %v1617_v41 }
  0x4e   : > { %1784 = vmatpush3.bf16.msra.mxu0 %v1876_v23 }
  0x4f   : > { %1785 = vmatprep.subr.bf16.mxu0 %v1877_v7 }
  0x52   : > { %1786 = vmatpush3.bf16.msra.mxu0 %v1877_v7 }
  0x53   : > { %1787 = vmatprep.subr.bf16.mxu0 %v1878_v8 }
  0x56   : > { %1788 = vmatpush3.bf16.msra.mxu0 %v1878_v8 }
  0x57   : > { %1789 = vmatprep.subr.bf16.mxu0 %v1879_v53 }
  0x5a   : > { %1790 = vmatpush3.bf16.msra.mxu0 %v1879_v53 }
 0x10c   : > { %v1745_v13 = vpop.f32.mrb[0].mxu0 }
 0x10d   : > { %v978_v45 = vpop.f32.mrb[1].mxu0  ;;  %v2343_v51 = vadd.f32 %v1745_v13, %v1613_v44 }
 0x10e   : > { %v1746_v46 = vpop.f32.mrb[2].mxu0  ;;  %v2339_v49 = vadd.f32 %v1613_v44, %v978_v45 }
 0x10f   : > { %v2337_v47 = vadd.f32 %v1746_v46, %v1613_v44  ;;  %v981_v48 = vpop.f32.mrb[3].mxu0 }
 0x110   : > { %v2341_v50 = vadd.f32 %v1613_v44, %v981_v48 }
 0x111   : > { %v1010_v55 = vpack.c.bf16 %v2337_v47, %v2343_v51 }
 0x112   : > { %v1009_v54 = vpack.c.bf16 %v2341_v50, %v2339_v49 }
 0x114   : > { %1767 = vmatprep.mubr.bf16.mxu1 %v1009_v54 }
 0x115   : > { %1768 = vmatmul.mubr.bf16.vlgmr.msra.gmra.mrb[0].mxu1 %v1010_v55 }
 0x116   : > { %1807 = vmatpush3.bf16.msra.mxu1 %v1872_v0 }
 0x117   : > { %1800 = vmatprep.subr.bf16.mxu1 %v1873_v1 }
 0x11a   : > { %1808 = vmatpush3.bf16.msra.mxu1 %v1873_v1 }
 0x11b   : > { %1801 = vmatprep.subr.bf16.mxu1 %v1874_v22 }
 0x11e   : > { %1809 = vmatpush3.bf16.msra.mxu1 %v1874_v22 }
 0x11f   : > { %1802 = vmatprep.subr.bf16.mxu1 %v1875_v6 }
 0x120   : > { %v1749_v56 = vpop.f32.mrb[4].mxu0 }
 0x121   : > { %v994_v57 = vpop.f32.mrb[5].mxu0  ;;  %v2355_v62 = vadd.f32 %v1749_v56, %v1613_v44 }
 0x122   : > { %v1750_v58 = vpop.f32.mrb[6].mxu0  ;;  %v2351_v29 = vadd.f32 %v1613_v44, %v994_v57  ;;  %1810 = vmatpush3.bf16.msra.mxu1 %v1875_v6 }
 0x123   : > { %v2349_v59 = vadd.f32 %v1750_v58, %v1613_v44  ;;  %v997_v60 = vpop.f32.mrb[7].mxu0  ;;  %1803 = vmatprep.subr.bf16.mxu1 %v1876_v23 }
 0x124   : > { %v2353_v61 = vadd.f32 %v1613_v44, %v997_v60 }
 0x125   : > { %v1012_v2 = vpack.c.bf16 %v2349_v59, %v2355_v62 }
 0x126   : > { %v1011_v63 = vpack.c.bf16 %v2353_v61, %v2351_v29  ;;  %1811 = vmatpush3.bf16.msra.mxu1 %v1876_v23 }
 0x127   : > { %1804 = vmatprep.subr.bf16.mxu1 %v1877_v7 }
 0x128   : > { %1771 = vmatprep.mubr.bf16.mxu1 %v1011_v63 }
 0x129   : > { %1772 = vmatmul.mubr.bf16.gmra.mrb[4].mxu1 %v1012_v2 }
 0x12a   : > { %1812 = vmatpush3.bf16.msra.mxu1 %v1877_v7 }
 0x12b   : > { %1805 = vmatprep.subr.bf16.mxu1 %v1878_v8 }
 0x12e   : > { %1813 = vmatpush3.bf16.msra.mxu1 %v1878_v8 }
 0x12f   : > { %1806 = vmatprep.subr.bf16.mxu1 %v1879_v53 }
 0x132   : > { %1814 = vmatpush3.bf16.msra.mxu1 %v1879_v53 }
 0x1e8   : > { %v1769_v10 = vpop.f32.mrb[0].mxu1 }
 0x1e9   : > { %v1127_v31 = vadd.f32 %v1769_v10, %v1626_v9  ;;  %v1118_v11 = vpop.f32.mrb[1].mxu1 }
 0x1ea   : > { %v1119_v12 = vadd.f32 %v1626_v9, %v1118_v11  ;;  %v1770_v14 = vpop.f32.mrb[2].mxu1 }
 0x1eb   : > { %v1159_v15 = vmul.f32 0.044715, %v1127_v31  ;;  %v1130_v52 = vadd.f32 %v1770_v14, %v1626_v9  ;;  %v1121_v16 = vpop.f32.mrb[3].mxu1  ;;  %v1151_v44 = vmul.f32 0.5, %v1127_v31 }
 0x1ec   : > { %v1157_v17 = vmul.f32 0.044715, %v1119_v12  ;;  %v1122_v18 = vadd.f32 %v1626_v9, %v1121_v16  ;;  %v1149_v58 = vmul.f32 0.5, %v1119_v12 }
 0x1ed   : > { %v1167_v19 = vmul.f32 %v1159_v15, %v1127_v31  ;;  %v1160_v20 = vmul.f32 0.044715, %v1130_v52  ;;  %v1152_v2 = vmul.f32 0.5, %v1130_v52 }
 0x1ee   : > { %v1165_v21 = vmul.f32 %v1157_v17, %v1119_v12  ;;  %v1158_v5 = vmul.f32 0.044715, %v1122_v18  ;;  %v1150_v7 = vmul.f32 0.5, %v1122_v18 }
 0x1ef   : > { %v1175_v24 = vmul.f32 %v1167_v19, %v1127_v31  ;;  %v1168_v25 = vmul.f32 %v1160_v20, %v1130_v52 }
 0x1f0   : > { %v1173_v26 = vmul.f32 %v1165_v21, %v1119_v12  ;;  %v1166_v27 = vmul.f32 %v1158_v5, %v1122_v18 }
 0x1f1   : > { %v1183_v28 = vadd.f32 %v1175_v24, %v1127_v31  ;;  %v1176_v30 = vmul.f32 %v1168_v25, %v1130_v52 }
 0x1f2   : > { %v1174_v32 = vmul.f32 %v1166_v27, %v1122_v18  ;;  %v1181_v33 = vadd.f32 %v1173_v26, %v1119_v12 }
 0x1f3   : > { %v1191_v34 = vmul.f32 0.7978846, %v1183_v28  ;;  %v1184_v3 = vadd.f32 %v1176_v30, %v1130_v52 }
 0x1f4   : > { %v1182_v35 = vadd.f32 %v1174_v32, %v1122_v18  ;;  %v1189_v36 = vmul.f32 0.7978846, %v1181_v33 }
 0x1f5   : > { %1880 = vtanh.f32 %v1191_v34  ;;  %v1192_v37 = vmul.f32 0.7978846, %v1184_v3 }
 0x1f6   : > { %v1190_v38 = vmul.f32 0.7978846, %v1182_v35  ;;  %1882 = vtanh.f32 %v1189_v36 }
 0x1f7   : > { %1884 = vtanh.f32 %v1192_v37 }
 0x1f8   : > { %1886 = vtanh.f32 %v1190_v38 }
 0x1fc   : > { %v1773_v4 = vpop.f32.mrb[4].mxu1 }
 0x1fd   : > { %v1143_v39 = vadd.f32 %v1773_v4, %v1626_v9  ;;  %v1134_v40 = vpop.f32.mrb[5].mxu1 }
 0x1fe   : > { %v1135_v42 = vadd.f32 %v1626_v9, %v1134_v40  ;;  %v1774_v43 = vpop.f32.mrb[6].mxu1 }
 0x1ff   : > { %v1881_v41 = vpop.eup %1880  ;;  %v1163_v45 = vmul.f32 0.044715, %v1143_v39  ;;  %v1146_v46 = vadd.f32 %v1774_v43, %v1626_v9  ;;  %v1137_v48 = vpop.f32.mrb[7].mxu1  ;;  %v1155_v35 = vmul.f32 0.5, %v1143_v39 }
 0x200   : > { %v1883_v13 = vpop.eup %1882  ;;  %v1207_v54 = vadd.f32 1.0, %v1881_v41  ;;  %v1161_v56 = vmul.f32 0.044715, %v1135_v42  ;;  %v1138_v57 = vadd.f32 %v1626_v9, %v1137_v48  ;;  %v1153_v38 = vmul.f32 0.5, %v1135_v42 }
 0x201   : > { %v1885_v55 = vpop.eup %1884  ;;  %v1205_v60 = vadd.f32 1.0, %v1883_v13  ;;  %v1171_v0 = vmul.f32 %v1163_v45, %v1143_v39  ;;  %v1164_v1 = vmul.f32 0.044715, %v1146_v46  ;;  %v1156_v36 = vmul.f32 0.5, %v1146_v46 }
 0x202   : > { %v1887_v63 = vpop.eup %1886  ;;  %v1208_v22 = vadd.f32 1.0, %v1885_v55  ;;  %v1169_v6 = vmul.f32 %v1161_v56, %v1135_v42  ;;  %v1162_v23 = vmul.f32 0.044715, %v1138_v57  ;;  %v1215_v31 = vmul.f32 %v1207_v54, %v1151_v44 }
 0x203   : > { %v1206_v8 = vadd.f32 1.0, %v1887_v63  ;;  %v1179_v53 = vmul.f32 %v1171_v0, %v1143_v39  ;;  %v1172_v10 = vmul.f32 %v1164_v1, %v1146_v46  ;;  %v1213_v16 = vmul.f32 %v1205_v60, %v1149_v58 }
 0x204   : > { %v1216_v11 = vmul.f32 %v1208_v22, %v1152_v2  ;;  %v1177_v14 = vmul.f32 %v1169_v6, %v1135_v42  ;;  %v1170_v15 = vmul.f32 %v1162_v23, %v1138_v57  ;;  %v1154_v4 = vmul.f32 0.5, %v1138_v57 }
 0x205   : > { %v1214_v17 = vmul.f32 %v1206_v8, %v1150_v7  ;;  %v1187_v9 = vadd.f32 %v1179_v53, %v1143_v39  ;;  %v1180_v12 = vmul.f32 %v1172_v10, %v1146_v46  ;;  %v1635_v39 = vld [vmem:[%s2428_s8] ss:$0 sm:$0xff] }
 0x206   : > { %v1222_v19 = vpack.c.bf16 %v1216_v11, %v1215_v31  ;;  %v1178_v20 = vmul.f32 %v1170_v15, %v1138_v57  ;;  %v1185_v21 = vadd.f32 %v1177_v14, %v1135_v42 }
 0x207   : > { %v1221_v52 = vpack.c.bf16 %v1214_v17, %v1213_v16  ;;  %v1195_v5 = vmul.f32 0.7978846, %v1187_v9  ;;  %v1188_v24 = vadd.f32 %v1180_v12, %v1146_v46 }
 0x208   : > { %v1186_v25 = vadd.f32 %v1178_v20, %v1138_v57  ;;  %v1193_v18 = vmul.f32 0.7978846, %v1185_v21 }
 0x209   : > { %1791 = vmatprep.mubr.bf16.mxu0 %v1221_v52  ;;  %1888 = vtanh.f32 %v1195_v5  ;;  %v1196_v26 = vmul.f32 0.7978846, %v1188_v24 }
 0x20a   : > { %1792 = vmatmul.mubr.bf16.vlgmr.msra.gmra.mrb[8].mxu0 %v1222_v19  ;;  %v1194_v27 = vmul.f32 0.7978846, %v1186_v25  ;;  %1890 = vtanh.f32 %v1193_v18 }
 0x20b   : > { %1892 = vtanh.f32 %v1196_v26 }
 0x20c   : > { %1894 = vtanh.f32 %v1194_v27 }
 0x213   : > { %v1889_v28 = vpop.eup %1888 }
 0x214   : > { %v1891_v30 = vpop.eup %1890  ;;  %v1211_v32 = vadd.f32 1.0, %v1889_v28 }
 0x215   : > { %v1893_v33 = vpop.eup %1892  ;;  %v1209_v34 = vadd.f32 1.0, %v1891_v30 }
 0x216   : > { %v1895_v3 = vpop.eup %1894  ;;  %v1212_v37 = vadd.f32 1.0, %v1893_v33  ;;  %v1219_v41 = vmul.f32 %v1211_v32, %v1155_v35 }
 0x217   : > { %v1210_v40 = vadd.f32 1.0, %v1895_v3  ;;  %v1217_v13 = vmul.f32 %v1209_v34, %v1153_v38 }
 0x218   : > { %v1220_v43 = vmul.f32 %v1212_v37, %v1156_v36 }
 0x219   : > { %v1218_v44 = vmul.f32 %v1210_v40, %v1154_v4 }
 0x21a   : > { %v1224_v45 = vpack.c.bf16 %v1220_v43, %v1219_v41 }
 0x21b   : > { %v1223_v48 = vpack.c.bf16 %v1218_v44, %v1217_v13 }
 0x21d   : > { %1795 = vmatprep.mubr.bf16.mxu1 %v1223_v48 }
 0x21e   : > { %1796 = vmatmul.mubr.bf16.vlgmr.msra.gmra.mrb[8].mxu1 %v1224_v45 }
 0x2dd   : > { %v1793_v46 = vpop.f32.mrb[8].mxu0 }
 0x2de   : > { %v1339_v42 = vadd.f32 %v1793_v46, %v1635_v39  ;;  %v1330_v54 = vpop.f32.mrb[9].mxu0 }
 0x2df   : > { %v1331_v55 = vadd.f32 %v1635_v39, %v1330_v54  ;;  %v1794_v56 = vpop.f32.mrb[10].mxu0 }
 0x2e0   : > { %v1342_v57 = vadd.f32 %v1794_v56, %v1635_v39  ;;  %v1333_v58 = vpop.f32.mrb[11].mxu0  ;;  %v1363_v63 = vadd.f32 %v1339_v42, %v2343_v51 }
 0x2e1   : > { %v1334_v60 = vadd.f32 %v1635_v39, %v1333_v58  ;;  %v1361_v0 = vadd.f32 %v1331_v55, %v2339_v49 }
 0x2e2   : > { %v1364_v2 = vadd.f32 %v1342_v57, %v2337_v47 }
 0x2e3   : > { %v1362_v1 = vadd.f32 %v1334_v60, %v2341_v50 }
 0x2e4   : > { %v1676_v22 = vpack.c.bf16 %v1364_v2, %v1363_v63 }
 0x2e5   : > { %v1671_v6 = vpack.c.bf16 %v1362_v1, %v1361_v0 }
 0x2e6   : > { %1688 = vst [vmem:[%s453_s16 + $0x8] sm:$0xff] %v1676_v22  }
 0x2e7   : > { %1672 = vst [vmem:[%s453_s16] sm:$0xff] %v1671_v6  }
 0x2f1   : > { %v1797_v23 = vpop.f32.mrb[8].mxu1 }
 0x2f2   : > { %v1355_v7 = vadd.f32 %v1797_v23, %v1635_v39  ;;  %v1346_v8 = vpop.f32.mrb[9].mxu1 }
 0x2f3   : > { %v1347_v53 = vadd.f32 %v1635_v39, %v1346_v8  ;;  %v1798_v10 = vpop.f32.mrb[10].mxu1 }
 0x2f4   : > { %v1358_v51 = vadd.f32 %v1798_v10, %v1635_v39  ;;  %v1349_v31 = vpop.f32.mrb[11].mxu1  ;;  %v1367_v49 = vadd.f32 %v1355_v7, %v2355_v62 }
 0x2f5   : > { %v1350_v47 = vadd.f32 %v1635_v39, %v1349_v31  ;;  %v1365_v14 = vadd.f32 %v1347_v53, %v2351_v29 }
 0x2f6   : > { %v1368_v11 = vadd.f32 %v1358_v51, %v2349_v59 }
 0x2f7   : > { %v1366_v50 = vadd.f32 %v1350_v47, %v2353_v61 }
 0x2f8   : > { %v1686_v15 = vpack.c.bf16 %v1368_v11, %v1367_v49 }
 0x2f9   : > { %v1681_v16 = vpack.c.bf16 %v1366_v50, %v1365_v14 }
 0x2fa   : > { %1690 = vst [vmem:[%s453_s16 + $0x18] sm:$0xff] %v1686_v15  }
 0x2fb   : > { %1689 = vst [vmem:[%s453_s16 + $0x10] sm:$0xff] %v1681_v16  }
 0x2fc PF: > { %s19_s13 = sadd.s32 1, %s1934_s13   ;;  %s2433_s30 = smov %s1926_s11 }
 0x2fd   : > { %p16_p9 = scmp.ge.s32.totalorder %s19_s13, 6   ;;  %s2434_s10 = smov %s1930_s12 }
 0x2fe   : > { %s2435_s11 = smov %s2438_s14  ;;  %s2436_s12 = smov %s2442_s15 }
 0x2ff   :  { %18 = sbr.rel (!%p16_p9) target bundleno = 3 (0x3), region = 103 }

</bundles_post_ra>
